<compile_context>
chip_gen: v6e
topology: v6e:2x2x1
jax: 0.10.0
libtpu: 0.0.40
codegen_flags: <defaults>
</compile_context>

<pallas_src>
import functools

import jax
import jax.numpy as jnp
from jax.experimental import pallas as pl
from jax.experimental.pallas import tpu as pltpu


def _net_kernel(xt_ref, w1t_ref, b1_ref, w2_ref, b2_ref, ot_ref):
    """One batch tile, batch on the lane axis.

    xt_ref : (n_feature, TB)       input tile, transposed (batch on lanes)
    w1t_ref: (n_hidden, n_feature) VMEM-resident
    b1_ref : (n_hidden, 1)         VMEM-resident
    w2_ref : (n_hidden, n_output)  VMEM-resident
    b2_ref : (n_output, 1)         VMEM-resident
    ot_ref : (n_output, TB)        output tile (single lane-dense store)
    """
    n_feature = w1t_ref.shape[1]
    n_output = w2_ref.shape[1]

    # ---- Layer 1: hidden = relu(W1 @ x + b1) as K=n_feature broadcast-FMAs ----
    h = b1_ref[...]                                   # (n_hidden, 1), broadcasts
    for k in range(n_feature):                        # static, tiny unroll
        h = h + w1t_ref[:, k:k + 1] * xt_ref[k:k + 1, :]
    h = jnp.maximum(h, 0.0)                           # ReLU, (n_hidden, TB) f32

    # ---- Layer 2: out_j = sum_h w2[h, j] * hidden[h, :] + b2_j ----
    # One XLU sublane-reduction per output row; rows are stacked so a single
    # (n_output, TB) store is issued (one vst instead of n_output masked vsts,
    # relieves v5e's single vector-store slot).
    rows = [jnp.sum(w2_ref[:, j:j + 1] * h, axis=0, keepdims=True)
            for j in range(n_output)]                 # each (1, TB)
    ot_ref[...] = jnp.concatenate(rows, axis=0) + b2_ref[...]


@functools.partial(jax.jit, static_argnames=("block_batch",))
def net_forward(x, w1, b1, w2, b2, *, block_batch=2048):
    """Forward of Net: relu(x @ W1 + b1) @ W2 + b2.

    x : (B, n_feature) f32
    w1: (n_feature, n_hidden)  (transposed vs. torch Linear.weight)
    b1: (n_hidden,)
    w2: (n_hidden, n_output)
    b2: (n_output,)
    Returns (B, n_output) f32.
    """
    B, n_feature = x.shape
    n_hidden = w1.shape[1]
    n_output = w2.shape[1]

    # Batch tiling: tiles are multiples of 128 lanes (>= 128) so every load /
    # store is lane-dense and the BlockSpec last dim is 128-divisible. Cap the
    # tile so the grid has >= 2 steps whenever the batch spans >= 2 lane
    # groups (keeps both v7x TensorCores busy), up to block_batch lanes per
    # tile to amortize per-grid-step overhead.
    lane_tiles = pl.cdiv(B, 128)                       # 128-lane groups in batch
    max_tpb = max(1, block_batch // 128)               # lane groups per tile cap
    tpb = min(max_tpb, max(1, lane_tiles // 2)) if lane_tiles >= 2 else 1
    tb = tpb * 128
    grid_len = pl.cdiv(lane_tiles, tpb)
    b_pad = grid_len * tb

    # Layout plumbing (fused under jit, single dispatch): batch -> lanes,
    # pad the batch to a whole number of tiles with jnp.pad (no zeros+scatter).
    xt = jnp.pad(x.astype(jnp.float32).T, ((0, 0), (0, b_pad - B)))
    w1t = w1.T.astype(jnp.float32)                     # (n_hidden, n_feature)
    b1c = b1.reshape(n_hidden, 1).astype(jnp.float32)
    w2f = w2.astype(jnp.float32)                       # (n_hidden, n_output)
    b2c = b2.reshape(n_output, 1).astype(jnp.float32)

    out_t = pl.pallas_call(
        _net_kernel,
        out_shape=jax.ShapeDtypeStruct((n_output, b_pad), jnp.float32),
        grid_spec=pltpu.PrefetchScalarGridSpec(
            num_scalar_prefetch=0,
            grid=(grid_len,),
            in_specs=[
                pl.BlockSpec((n_feature, tb), lambda i: (0, i)),        # x tile
                pl.BlockSpec((n_hidden, n_feature), lambda i: (0, 0)),  # resident
                pl.BlockSpec((n_hidden, 1), lambda i: (0, 0)),
                pl.BlockSpec((n_hidden, n_output), lambda i: (0, 0)),
                pl.BlockSpec((n_output, 1), lambda i: (0, 0)),
            ],
            out_specs=pl.BlockSpec((n_output, tb), lambda i: (0, i)),
        ),
        compiler_params=pltpu.CompilerParams(
            dimension_semantics=("parallel",),  # shard batch tiles over v7x's 2 TCs
        ),
    )(xt, w1t, b1c, w2f, b2c)

    # Padded batch lanes compute garbage from relu(b1); sliced off here.
    return out_t[:, :B].T


def init_net_params(key, n_feature, n_hidden, n_output):
    """Deterministic init mimicking torch.nn.Linear's uniform(-1/sqrt(fan_in), ...)."""
    k1, k2, k3, k4 = jax.random.split(key, 4)
    lim1 = 1.0 / jnp.sqrt(jnp.float32(n_feature))
    lim2 = 1.0 / jnp.sqrt(jnp.float32(n_hidden))
    w1 = jax.random.uniform(k1, (n_feature, n_hidden), jnp.float32, -lim1, lim1)
    b1 = jax.random.uniform(k2, (n_hidden,), jnp.float32, -lim1, lim1)
    w2 = jax.random.uniform(k3, (n_hidden, n_output), jnp.float32, -lim2, lim2)
    b2 = jax.random.uniform(k4, (n_output,), jnp.float32, -lim2, lim2)
    return w1, b1, w2, b2


if __name__ == "__main__":
    # Matches 分类.py: Net(n_feature=2, n_hidden=10, n_output=2), 100 points/cluster.
    n_per_cluster, n_feature, n_hidden, n_output = 100, 2, 10, 2
    B = 2 * n_per_cluster

    key = jax.random.PRNGKey(0)
    kx0, kx1, kp, kbig = jax.random.split(key, 4)
    # Two Gaussian clusters like torch.normal(+-2, 1).
    x0 = 2.0 + jax.random.normal(kx0, (n_per_cluster, n_feature), jnp.float32)
    x1 = -2.0 + jax.random.normal(kx1, (n_per_cluster, n_feature), jnp.float32)
    x = jnp.concatenate([x0, x1], axis=0)

    w1, b1, w2, b2 = init_net_params(kp, n_feature, n_hidden, n_output)

    # Pure-JAX reference.
    def ref_fwd(xi):
        return jnp.maximum(xi @ w1 + b1[None, :], 0.0) @ w2 + b2[None, :]

    # Default path: B=200 -> two 128-lane tiles, grid=(2,) (both TCs busy).
    out = net_forward(x, w1, b1, w2, b2)
    jax.block_until_ready(out)
    assert out.shape == (B, n_output)
    assert jnp.allclose(out, ref_fwd(x), atol=1e-5, rtol=1e-5), "mismatch vs reference"

    # Larger ragged batch: B=1000 -> tb=512, grid=(2,), exercises padding path.
    xb = jax.random.normal(kbig, (1000, n_feature), jnp.float32)
    outb = net_forward(xb, w1, b1, w2, b2)
    jax.block_until_ready(outb)
    assert jnp.allclose(outb, ref_fwd(xb), atol=1e-5, rtol=1e-5), "mismatch vs reference (big)"

    print("KERNEL_OK")
</pallas_src>

<mosaic_0001>
module attributes {stable_mosaic.version = 11 : i64} {
  func.func @_net_kernel(%arg0: i32, %arg1: memref<2x128xf32, #tpu.memory_space<vmem>>, %arg2: memref<10x2xf32, #tpu.memory_space<vmem>>, %arg3: memref<10x1xf32, #tpu.memory_space<vmem>>, %arg4: memref<10x2xf32, #tpu.memory_space<vmem>>, %arg5: memref<2x1xf32, #tpu.memory_space<vmem>>, %arg6: memref<2x128xf32, #tpu.memory_space<vmem>>) attributes {dimension_semantics = [#tpu.dimension_semantics<parallel>], iteration_bounds = array<i64: 2>, scalar_prefetch = 0 : i64, scratch_operands = 0 : i64, tpu.core_type = #tpu.core_type<tc>, window_params = [{transform_indices = @transform_0, window_bounds = array<i64: 2, 128>}, {pipeline_mode = #tpu.pipeline_mode<synchronous>, transform_indices = @transform_1, window_bounds = array<i64: 10, 2>}, {pipeline_mode = #tpu.pipeline_mode<synchronous>, transform_indices = @transform_2, window_bounds = array<i64: 10, 1>}, {pipeline_mode = #tpu.pipeline_mode<synchronous>, transform_indices = @transform_3, window_bounds = array<i64: 10, 2>}, {pipeline_mode = #tpu.pipeline_mode<synchronous>, transform_indices = @transform_4, window_bounds = array<i64: 2, 1>}, {transform_indices = @transform_5, window_bounds = array<i64: 2, 128>}]} {
    %c0 = arith.constant 0 : index
    %c0_0 = arith.constant 0 : index
    %0 = vector.load %arg3[%c0, %c0_0] : memref<10x1xf32, #tpu.memory_space<vmem>>, vector<10x1xf32>
    %c0_1 = arith.constant 0 : index
    %c0_2 = arith.constant 0 : index
    %1 = vector.load %arg2[%c0_1, %c0_2] : memref<10x2xf32, #tpu.memory_space<vmem>>, vector<10x1xf32>
    %c0_3 = arith.constant 0 : index
    %c0_4 = arith.constant 0 : index
    %2 = vector.load %arg1[%c0_3, %c0_4] : memref<2x128xf32, #tpu.memory_space<vmem>>, vector<1x128xf32>
    %3 = vector.broadcast %1 : vector<10x1xf32> to vector<10x128xf32>
    %4 = vector.broadcast %2 : vector<1x128xf32> to vector<10x128xf32>
    %5 = arith.mulf %3, %4 : vector<10x128xf32>
    %6 = vector.broadcast %0 : vector<10x1xf32> to vector<10x128xf32>
    %7 = arith.addf %6, %5 : vector<10x128xf32>
    %c0_5 = arith.constant 0 : index
    %c1 = arith.constant 1 : index
    %8 = vector.load %arg2[%c0_5, %c1] : memref<10x2xf32, #tpu.memory_space<vmem>>, vector<10x1xf32>
    %c1_6 = arith.constant 1 : index
    %c0_7 = arith.constant 0 : index
    %9 = vector.load %arg1[%c1_6, %c0_7] : memref<2x128xf32, #tpu.memory_space<vmem>>, vector<1x128xf32>
    %10 = vector.broadcast %8 : vector<10x1xf32> to vector<10x128xf32>
    %11 = vector.broadcast %9 : vector<1x128xf32> to vector<10x128xf32>
    %12 = arith.mulf %10, %11 : vector<10x128xf32>
    %13 = arith.addf %7, %12 : vector<10x128xf32>
    %cst = arith.constant 0.000000e+00 : f32
    %14 = vector.broadcast %cst : f32 to vector<10x128xf32>
    %15 = arith.maximumf %13, %14 : vector<10x128xf32>
    %c0_8 = arith.constant 0 : index
    %c0_9 = arith.constant 0 : index
    %16 = vector.load %arg4[%c0_8, %c0_9] : memref<10x2xf32, #tpu.memory_space<vmem>>, vector<10x1xf32>
    %17 = vector.broadcast %16 : vector<10x1xf32> to vector<10x128xf32>
    %18 = arith.mulf %17, %15 : vector<10x128xf32>
    %cst_10 = arith.constant dense<0.000000e+00> : vector<128xf32>
    %19 = vector.multi_reduction <add>, %18, %cst_10 [0] : vector<10x128xf32> to vector<128xf32>
    %20 = vector.shape_cast %19 : vector<128xf32> to vector<1x128xf32>
    %c0_11 = arith.constant 0 : index
    %c1_12 = arith.constant 1 : index
    %21 = vector.load %arg4[%c0_11, %c1_12] : memref<10x2xf32, #tpu.memory_space<vmem>>, vector<10x1xf32>
    %22 = vector.broadcast %21 : vector<10x1xf32> to vector<10x128xf32>
    %23 = arith.mulf %22, %15 : vector<10x128xf32>
    %cst_13 = arith.constant dense<0.000000e+00> : vector<128xf32>
    %24 = vector.multi_reduction <add>, %23, %cst_13 [0] : vector<10x128xf32> to vector<128xf32>
    %25 = vector.shape_cast %24 : vector<128xf32> to vector<1x128xf32>
    %26 = tpu.concatenate %20, %25 in 0 : vector<1x128xf32>, vector<1x128xf32> -> vector<2x128xf32>
    %c0_14 = arith.constant 0 : index
    %c0_15 = arith.constant 0 : index
    %27 = vector.load %arg5[%c0_14, %c0_15] : memref<2x1xf32, #tpu.memory_space<vmem>>, vector<2x1xf32>
    %28 = vector.broadcast %27 : vector<2x1xf32> to vector<2x128xf32>
    %29 = arith.addf %26, %28 : vector<2x128xf32>
    %c0_16 = arith.constant 0 : index
    %c0_17 = arith.constant 0 : index
    %30 = vector.load %arg6[%c0_16, %c0_17] : memref<2x128xf32, #tpu.memory_space<vmem>>, vector<2x128xf32>
    tpu.vector_store %arg6[%c0_16, %c0_17], %29 {strides = array<i32>} : memref<2x128xf32, #tpu.memory_space<vmem>>, vector<2x128xf32>,
    return
  }
  func.func @transform_0(%arg0: i32) -> (i32, i32) {
    %c0_i32 = arith.constant 0 : i32
    %c0_i32_0 = arith.constant 0 : i32
    return %c0_i32, %arg0 : i32, i32
  }
  func.func @transform_1(%arg0: i32) -> (i32, i32) {
    %c0_i32 = arith.constant 0 : i32
    %c0_i32_0 = arith.constant 0 : i32
    %c0_i32_1 = arith.constant 0 : i32
    return %c0_i32, %c0_i32_0 : i32, i32
  }
  func.func @transform_2(%arg0: i32) -> (i32, i32) {
    %c0_i32 = arith.constant 0 : i32
    %c0_i32_0 = arith.constant 0 : i32
    %c0_i32_1 = arith.constant 0 : i32
    return %c0_i32, %c0_i32_0 : i32, i32
  }
  func.func @transform_3(%arg0: i32) -> (i32, i32) {
    %c0_i32 = arith.constant 0 : i32
    %c0_i32_0 = arith.constant 0 : i32
    %c0_i32_1 = arith.constant 0 : i32
    return %c0_i32, %c0_i32_0 : i32, i32
  }
  func.func @transform_4(%arg0: i32) -> (i32, i32) {
    %c0_i32 = arith.constant 0 : i32
    %c0_i32_0 = arith.constant 0 : i32
    %c0_i32_1 = arith.constant 0 : i32
    return %c0_i32, %c0_i32_0 : i32, i32
  }
  func.func @transform_5(%arg0: i32) -> (i32, i32) {
    %c0_i32 = arith.constant 0 : i32
    %c0_i32_0 = arith.constant 0 : i32
    return %c0_i32, %arg0 : i32, i32
  }
}

</mosaic_0001>

<bundles_post_ra>
// kernel: net_forward.1
= control target key start
LH: loop header
LB: loop body
LE: loop exit
PB: predicated region body
PF: predicated region fallthrough
CT: control target
= control target key end

     0   :  { %s440_s18 = smov 0   ;;  %s485_s0 = inlined_call_operand.vmem [shape: f32[2,256], index: 0, kind: input, shape index: {}]   ;;  %s486_s1 = inlined_call_operand.vmem [shape: f32[10,2], index: 1, kind: input, shape index: {}]   ;;  %s487_s2 = inlined_call_operand.vmem [shape: f32[10,1], index: 2, kind: input, shape index: {}]   ;;  %s488_s3 = inlined_call_operand.vmem [shape: f32[10,2], index: 3, kind: input, shape index: {}]   ;;  %s489_s4 = inlined_call_operand.vmem [shape: f32[2,1], index: 4, kind: input, shape index: {}]   ;;  %s490_s5 = inlined_call_operand.vmem [shape: f32[2,256], index: 5, kind: output, shape index: {}]  }
   0x1 LB: > { %s376_s19 = sadd.s32 4294967295, %s406_s18   ;;  %p380_p0 = scmp.ge.s32.totalorder %s406_s18, 1  ;;  %s406_s18 = sphi %s440_s18, %s15_s18  }
   0x2   : > { %p186_p1 = scmp.lt.s32.totalorder %s406_s18, 3 }
   0x4   : > { %p187_p2 = pnand %p380_p0, %p186_p1 }
   0x5   : > { %p212_p3 = scmp.lt.s32.totalorder (!%p187_p2), %s376_s19, 1 }
   0x6   : > { %190 = sbr.rel (%p187_p2) target bundleno = 174 (0xae), region = 40 }
   0xb   : > { %v223_v0 = vld [vmem:[%s486_s1 + $0x8] sm:$0x3]  ;;  %v408_v2 = vmov 0   ;;  %v222_v3 = vld [vmem:[%s486_s1] sm:$0xff]  ;;  %v409_v4 = vmov 1   ;;  %s492_s19 = smov (!%p212_p3, %s376_s19), 1 }
   0xc   : > { %v221_v1 = vld [vmem:[%s487_s2 + $0x8] sm:$0x3]  ;;  %398 = vset.pattern.permute.xlu1 %v408_v2  ;;  %397 = vset.pattern.permute.xlu0 %v408_v2  ;;  %v220_v5 = vld [vmem:[%s487_s2] sm:$0xff]  ;;  %s381_s9 = sshll.u32 %s492_s19, 1  ;;  %vm286_vm0 = vcmask 1041408   ;;  %vm313_vm1 = vcmask 1040384  }
   0xd   : > { %232 = vperm.xlu0 %397, %v223_v0   ;;  %248 = vperm.xlu1 %398, %v221_v1   ;;  %v273_v6 = vld [vmem:[%s488_s3 + $0x8] sm:$0x3]  ;;  %v272_v7 = vld [vmem:[%s488_s3] sm:$0xff]  ;;  %s215_s12 = scalar_lea.vmem %s485_s0, %s381_s9  ;;  %s219_s15 = scalar_lea.vmem %s490_s5, %s381_s9 }
   0xe   : > { %v315_v8 = vld [vmem:[%s489_s4] sm:$0x3] }
   0xf   : > { %v383_v9 = vld [vmem:[%s215_s12] ss:$0 sm:$0xff]  ;;  %v384_v13 = vld [vmem:[%s215_s12 + $0x1] ss:$0 sm:$0xff] }
  0x11   : > { %227 = vperm.xlu0 %397, %v222_v3   ;;  %399 = vset.pattern.permute.xlu1 %v409_v4 }
  0x12   : > { %259 = vperm.xlu1 %399, %v223_v0  }
  0x15   : > { %243 = vperm.xlu0 %397, %v220_v5  }
  0x16   : > { %255 = vperm.xlu1 %399, %v222_v3  }
  0x19   : > { %281 = vperm.xlu0 %397, %v273_v6  }
  0x1a   : > { %300 = vperm.xlu1 %399, %v273_v6  }
  0x1d   : > { %276 = vperm.xlu0 %397, %v272_v7  }
  0x1e   : > { %296 = vperm.xlu1 %399, %v272_v7  }
  0x21   : > { %318 = vperm.xlu0 %397, %v315_v8  }
  0x88   : > { %v233_v10 = vpop.permute.xlu0 %232  ;;  %v249_v11 = vpop.permute.xlu1 %248 }
  0x89   : > { %v240_v12 = vmul.f32 %v383_v9, %v233_v10 }
  0x8b   : > { %v252_v16 = vadd.f32 %v249_v11, %v240_v12 }
  0x8c   : > { %v228_v14 = vpop.permute.xlu0 %227 }
  0x8d   : > { %v260_v15 = vpop.permute.xlu1 %259  ;;  %v239_v18 = vmul.f32 %v383_v9, %v228_v14 }
  0x8e   : > { %v267_v17 = vmul.f32 %v384_v13, %v260_v15 }
  0x90   : > { %v269_v19 = vadd.f32 %v267_v17, %v252_v16  ;;  %v244_v20 = vpop.permute.xlu0 %243 }
  0x91   : > { %v251_v21 = vadd.f32 %v244_v20, %v239_v18  ;;  %v256_v22 = vpop.permute.xlu1 %255 }
  0x92   : > { %v266_v23 = vmul.f32 %v384_v13, %v256_v22  ;;  %v271_v24 = vmax.f32 %v269_v19, 0.0 }
  0x94   : > { %v268_v25 = vadd.f32 %v266_v23, %v251_v21  ;;  %v282_v26 = vpop.permute.xlu0 %281 }
  0x95   : > { %v301_v27 = vpop.permute.xlu1 %300  ;;  %v285_v28 = vmul.f32 %v282_v26, %v271_v24 }
  0x96   : > { %v270_v29 = vmax.f32 %v268_v25, 0.0  ;;  %v304_v30 = vmul.f32 %v301_v27, %v271_v24 }
  0x97   : > { %v287_v34 = vsel %vm286_vm0, %v285_v28, 0.0 }
  0x98   : > { %v277_v31 = vpop.permute.xlu0 %276  ;;  %v305_v36 = vsel %vm286_vm0, %v304_v30, 0.0 }
  0x99   : > { %v284_v32 = vmul.f32 %v277_v31, %v270_v29  ;;  %v297_v33 = vpop.permute.xlu1 %296 }
  0x9a   : > { %v303_v35 = vmul.f32 %v297_v33, %v270_v29 }
  0x9b   : > { %v288_v37 = vadd.f32 %v287_v34, %v284_v32 }
  0x9c   : > { %v306_v38 = vadd.f32 %v305_v36, %v303_v35  ;;  %v319_v51 = vpop.permute.xlu0 %318 }
  0x9d   : > { %v289_v39 = vrot.slane %v288_v37, 4 }
  0x9e   : > { %v307_v40 = vrot.slane %v306_v38, 4 }
  0x9f   : > { %v290_v41 = vadd.f32 %v289_v39, %v288_v37 }
  0xa0   : > { %v308_v42 = vadd.f32 %v307_v40, %v306_v38 }
  0xa1   : > { %v291_v43 = vrot.slane %v290_v41, 2 }
  0xa2   : > { %v309_v44 = vrot.slane %v308_v42, 2 }
  0xa3   : > { %v292_v45 = vadd.f32 %v291_v43, %v290_v41 }
  0xa4   : > { %v310_v46 = vadd.f32 %v309_v44, %v308_v42 }
  0xa5   : > { %v293_v47 = vrot.slane %v292_v45, 1 }
  0xa6   : > { %v311_v48 = vrot.slane %v310_v46, 1 }
  0xa7   : > { %v294_v49 = vadd.f32 %v293_v47, %v292_v45 }
  0xa8   : > { %v312_v50 = vadd.f32 %v311_v48, %v310_v46 }
  0xaa   : > { %v314_v52 = vsel %vm313_vm1, %v294_v49, %v312_v50 }
  0xab   : > { %v321_v53 = vadd.f32 %v319_v51, %v314_v52 }
  0xad   : > { %322 = vst [vmem:[%s219_s15] sm:$0x3] %v321_v53 }
  0xae PF: > { %s15_s18 = sadd.s32 1, %s406_s18  }
  0xaf   : > { %p12_p4 = scmp.ge.s32.totalorder %s15_s18, 4  }
  0xb1   :  { %14 = sbr.rel (!%p12_p4) target bundleno = 1 (0x1), region = 70 }

</bundles_post_ra>
